<compile_context>
chip_gen: v5e
topology: v5e:2x2
jax: 0.10.0
libtpu: 0.0.40
codegen_flags: <defaults>
</compile_context>

<pallas_src>
import functools
import math

import jax
import jax.numpy as jnp
from jax.experimental import pallas as pl
from jax.experimental.pallas import tpu as pltpu

EPS = 1e-07


# ----------------------------------------------------------------------------
# helpers
# ----------------------------------------------------------------------------
def _round_up(x, m):
    return ((x + m - 1) // m) * m


def _pad2d(x, rows, cols):
    r, c = x.shape
    if r == rows and c == cols:
        return x
    return jnp.pad(x, ((0, rows - r), (0, cols - c)))


def _pick_block_rows(n_rows, row_bytes, n_arrays, requested=256,
                     vmem_budget=12 * 1024 * 1024):
    """Largest row block (multiple of 8, <= requested) such that
    n_arrays x 2 pipeline buffers x block bytes stays under a conservative
    VMEM budget (safe for v7x's 64 MiB / 32 MiB scoped default)."""
    bm = min(requested, _round_up(n_rows, 8))
    bm = max(8, (bm // 8) * 8)
    while bm > 8 and bm * row_bytes * n_arrays * 2 > vmem_budget:
        bm = max(8, ((bm // 2) // 8) * 8)
    return bm


# ----------------------------------------------------------------------------
# Kernel 1: fused Embed = Linear + L2 normalize   (Embed.forward)
# ----------------------------------------------------------------------------
def _embed_kernel(x_ref, w_ref, b_ref, o_ref, acc_ref):
    k = pl.program_id(1)

    @pl.when(k == 0)
    def _init():
        acc_ref[...] = jnp.zeros_like(acc_ref)

    acc_ref[...] += jnp.dot(
        x_ref[...].astype(jnp.float32),
        w_ref[...].astype(jnp.float32),
        preferred_element_type=jnp.float32,
    )

    @pl.when(k == pl.num_programs(1) - 1)
    def _finalize():
        z = acc_ref[...] + b_ref[...].astype(jnp.float32)
        s = jnp.sum(z * z, axis=-1, keepdims=True)
        # rsqrt: single EUP op instead of sqrt + exact reciprocal (perf feedback).
        o_ref[...] = (z * jax.lax.rsqrt(s)).astype(o_ref.dtype)


def embed(x, w, b, *, block_rows=256, block_k=512):
    """L2-normalized linear projection: normalize(x @ w + b) over the feature dim.

    x: (B, Din), w: (Din, Dout), b: (Dout,) -> (B, Dout) float32.
    Rows and both feature dims are zero-padded (neutral for matmul / L2 norm)
    so arbitrary shapes work; padding is sliced off at the end.
    """
    n, d_in = x.shape
    d_out = w.shape[1]
    d_out_p = _round_up(d_out, 128)
    bk = min(block_k, _round_up(d_in, 128))
    d_in_p = _round_up(d_in, bk)
    bm = _pick_block_rows(n, (bk + d_out_p) * 4, 3, requested=block_rows)
    n_p = _round_up(n, bm)

    x_p = _pad2d(x.astype(jnp.float32), n_p, d_in_p)
    w_p = _pad2d(w.astype(jnp.float32), d_in_p, d_out_p)
    b_p = _pad2d(b.reshape(1, -1).astype(jnp.float32), 1, d_out_p)

    out = pl.pallas_call(
        _embed_kernel,
        out_shape=jax.ShapeDtypeStruct((n_p, d_out_p), jnp.float32),
        grid_spec=pltpu.PrefetchScalarGridSpec(
            num_scalar_prefetch=0,
            grid=(n_p // bm, d_in_p // bk),
            in_specs=[
                pl.BlockSpec((bm, bk), lambda i, k: (i, k)),
                pl.BlockSpec((bk, d_out_p), lambda i, k: (k, 0)),
                pl.BlockSpec((1, d_out_p), lambda i, k: (0, 0)),
            ],
            out_specs=pl.BlockSpec((bm, d_out_p), lambda i, k: (i, 0)),
            scratch_shapes=[pltpu.VMEM((bm, d_out_p), jnp.float32)],
        ),
        compiler_params=pltpu.CompilerParams(
            dimension_semantics=("parallel", "arbitrary"),
        ),
        cost_estimate=pl.CostEstimate(
            flops=2 * n_p * d_in_p * d_out_p + 3 * n_p * d_out_p,
            transcendentals=n_p,
            bytes_accessed=4 * (n_p * d_in_p + d_in_p * d_out_p + 2 * n_p * d_out_p),
        ),
    )(x_p, w_p, b_p)
    return out[:n, :d_out]


# ----------------------------------------------------------------------------
# Kernel 2: contrast scores  exp(bmm(weight, v) / T)   (ContrastMemory.forward)
# ----------------------------------------------------------------------------
def _scores_kernel(w_ref, v_ref, o_ref, *, inv_t):
    w = w_ref[...].astype(jnp.float32)            # (1, K1, D)
    v = v_ref[...].astype(jnp.float32)            # (1, 1, D)
    s = jnp.sum(w * v, axis=-1, keepdims=True)    # (1, K1, 1), lane reduction
    o_ref[...] = jnp.exp(s * inv_t)


def contrast_scores(weights, v, temperature):
    """weights: (B, K+1, D) gathered memory rows, v: (B, D) -> exp scores (B, K+1, 1)."""
    bsz, k1, d = weights.shape
    d_p = _round_up(d, 128)
    w_p = jnp.pad(weights.astype(jnp.float32), ((0, 0), (0, 0), (0, d_p - d)))
    v_p = _pad2d(v.astype(jnp.float32), bsz, d_p).reshape(bsz, 1, d_p)

    return pl.pallas_call(
        functools.partial(_scores_kernel, inv_t=1.0 / float(temperature)),
        out_shape=jax.ShapeDtypeStruct((bsz, k1, 1), jnp.float32),
        grid_spec=pltpu.PrefetchScalarGridSpec(
            num_scalar_prefetch=0,
            grid=(bsz,),
            in_specs=[
                pl.BlockSpec((1, k1, d_p), lambda b: (b, 0, 0)),
                pl.BlockSpec((1, 1, d_p), lambda b: (b, 0, 0)),
            ],
            out_specs=pl.BlockSpec((1, k1, 1), lambda b: (b, 0, 0)),
        ),
        compiler_params=pltpu.CompilerParams(
            dimension_semantics=("parallel",),
        ),
        cost_estimate=pl.CostEstimate(
            flops=2 * bsz * k1 * d_p,
            transcendentals=bsz * k1,
            bytes_accessed=4 * (bsz * k1 * d_p + bsz * d_p + bsz * k1),
        ),
    )(w_p, v_p)


# ----------------------------------------------------------------------------
# Kernel 3: NCE contrast loss reduction           (ContrastLoss.forward)
# ----------------------------------------------------------------------------
def _loss_kernel(x_ref, o_ref, *, noise_const, bsz):
    x = x_ref[...].astype(jnp.float32)                       # (B, K1, 1)
    c = jnp.float32(noise_const)
    k_idx = jax.lax.broadcasted_iota(jnp.int32, x.shape, 1)  # position along K1
    num = jnp.where(k_idx == 0, x, c)                        # pos: P; neg: m*Pn
    d = num / (x + jnp.float32(noise_const + EPS))
    ld = jnp.log(d)
    s = jnp.sum(ld, axis=1, keepdims=True)                   # (B, 1, 1)
    s = jnp.sum(s, axis=0, keepdims=True)                    # (1, 1, 1)
    o_ref[...] = -s / jnp.float32(bsz)


def contrast_loss(x, n_data):
    """x: (B, K+1, 1) positive-first exp scores -> scalar NCE loss."""
    bsz, k1, _ = x.shape
    m = k1 - 1
    noise_const = float(m) / float(n_data)   # m * Pn
    out = pl.pallas_call(
        functools.partial(_loss_kernel, noise_const=noise_const, bsz=bsz),
        out_shape=jax.ShapeDtypeStruct((1, 1, 1), jnp.float32),
        grid_spec=pltpu.PrefetchScalarGridSpec(
            num_scalar_prefetch=0,
            grid=(1,),
            in_specs=[pl.BlockSpec((bsz, k1, 1), lambda i: (0, 0, 0))],
            out_specs=pl.BlockSpec((1, 1, 1), lambda i: (0, 0, 0)),
        ),
        compiler_params=pltpu.CompilerParams(
            dimension_semantics=("arbitrary",),
        ),
    )(x.astype(jnp.float32))
    return out[0, 0, 0]


# ----------------------------------------------------------------------------
# Kernel 4: memory update = L2-normalize(momentum * mem_row + (1-m) * v)
# ----------------------------------------------------------------------------
def _mom_norm_kernel(mem_ref, v_ref, o_ref, *, momentum):
    z = (mem_ref[...].astype(jnp.float32) * momentum
         + v_ref[...].astype(jnp.float32) * (1.0 - momentum))
    s = jnp.sum(z * z, axis=-1, keepdims=True)
    o_ref[...] = (z * jax.lax.rsqrt(s)).astype(o_ref.dtype)


def momentum_update_normalize(mem_rows, v, momentum, *, block_rows=256):
    n, d = mem_rows.shape
    d_p = _round_up(d, 128)
    bm = _pick_block_rows(n, d_p * 4, 3, requested=block_rows)
    n_p = _round_up(n, bm)
    mem_p = _pad2d(mem_rows.astype(jnp.float32), n_p, d_p)
    v_p = _pad2d(v.astype(jnp.float32), n_p, d_p)
    out = pl.pallas_call(
        functools.partial(_mom_norm_kernel, momentum=float(momentum)),
        out_shape=jax.ShapeDtypeStruct((n_p, d_p), jnp.float32),
        grid_spec=pltpu.PrefetchScalarGridSpec(
            num_scalar_prefetch=0,
            grid=(n_p // bm,),
            in_specs=[
                pl.BlockSpec((bm, d_p), lambda i: (i, 0)),
                pl.BlockSpec((bm, d_p), lambda i: (i, 0)),
            ],
            out_specs=pl.BlockSpec((bm, d_p), lambda i: (i, 0)),
        ),
        compiler_params=pltpu.CompilerParams(
            dimension_semantics=("parallel",),
        ),
        cost_estimate=pl.CostEstimate(
            flops=6 * n_p * d_p, transcendentals=n_p,
            bytes_accessed=4 * 3 * n_p * d_p),
    )(mem_p, v_p)
    return out[:n, :d]


# ----------------------------------------------------------------------------
# Full CRDLoss forward (functional: returns loss + updated memory buffers)
# ----------------------------------------------------------------------------
def crd_loss_forward(params, f_s, f_t, y, contrast_idx, *,
                     nce_t=0.07, nce_m=0.5, n_data=None, save=True):
    bsz = f_s.shape[0]
    f_s = f_s.reshape(bsz, -1)
    f_t = f_t.reshape(bsz, -1)

    # Embed (fused Linear + L2 normalize Pallas kernels).
    v1 = embed(f_s, params["w_s"], params["b_s"])     # student embedding
    v2 = embed(f_t, params["w_t"], params["b_t"])     # teacher embedding
    feat = v1.shape[1]

    # Index table: positive index first, then negatives (same layout the reference
    # builds when contrast_idx is None).  AliasMethod sampling is host-side.
    idx = jnp.concatenate([y[:, None].astype(jnp.int32),
                           contrast_idx.astype(jnp.int32)], axis=1)      # (B, K+1)
    k1 = idx.shape[1]

    # Gather memory rows (kept as an XLA gather; the hot bmm+exp runs in Pallas).
    w1 = jnp.take(params["memory_v1"], idx.reshape(-1), axis=0).reshape(bsz, k1, feat)
    w2 = jnp.take(params["memory_v2"], idx.reshape(-1), axis=0).reshape(bsz, k1, feat)

    out_v2 = contrast_scores(w1, v2, nce_t)   # teacher anchor vs student memory
    out_v1 = contrast_scores(w2, v1, nce_t)   # student anchor vs teacher memory

    # First-call normalization constants (set but not applied, as in the reference).
    z_v1 = jnp.mean(out_v1) * params["memory_v1"].shape[0]
    z_v2 = jnp.mean(out_v2) * params["memory_v2"].shape[0]

    new_mem_v1, new_mem_v2 = params["memory_v1"], params["memory_v2"]
    if save:
        upd1 = momentum_update_normalize(params["memory_v1"][y], v1, nce_m)
        upd2 = momentum_update_normalize(params["memory_v2"][y], v2, nce_m)
        new_mem_v1 = params["memory_v1"].at[y].set(upd1)
        new_mem_v2 = params["memory_v2"].at[y].set(upd2)

    # TODO(synk): acc_D0/acc_D1 host-side numpy metrics (return_acc=True path) are not computed.
    s_loss = contrast_loss(out_v1, n_data)
    t_loss = contrast_loss(out_v2, n_data)
    loss = s_loss + t_loss
    return loss, (new_mem_v1, new_mem_v2, z_v1, z_v2)


# ----------------------------------------------------------------------------
# demo + correctness check
# ----------------------------------------------------------------------------
if __name__ == "__main__":
    key = jax.random.PRNGKey(0)
    ks = jax.random.split(key, 8)

    bsz, s_dim, t_dim, feat_dim = 8, 256, 384, 128
    n_data, nce_k, nce_t, nce_m = 64, 16, 0.07, 0.5

    stdv = 1.0 / math.sqrt(feat_dim / 3.0)
    params = {
        "w_s": jax.random.normal(ks[0], (s_dim, feat_dim), jnp.float32) * 0.05,
        "b_s": jax.random.normal(ks[1], (feat_dim,), jnp.float32) * 0.01,
        "w_t": jax.random.normal(ks[2], (t_dim, feat_dim), jnp.float32) * 0.05,
        "b_t": jax.random.normal(ks[3], (feat_dim,), jnp.float32) * 0.01,
        "memory_v1": jax.random.uniform(ks[4], (n_data, feat_dim), jnp.float32, -stdv, stdv),
        "memory_v2": jax.random.uniform(ks[5], (n_data, feat_dim), jnp.float32, -stdv, stdv),
    }
    f_s = jax.random.normal(ks[6], (bsz, s_dim), jnp.float32)
    f_t = jax.random.normal(ks[7], (bsz, t_dim), jnp.float32)
    y = jnp.arange(bsz, dtype=jnp.int32)
    contrast_idx = jax.random.randint(jax.random.PRNGKey(42), (bsz, nce_k), 0, n_data, jnp.int32)

    loss, (mem1, mem2, z1, z2) = crd_loss_forward(
        params, f_s, f_t, y, contrast_idx,
        nce_t=nce_t, nce_m=nce_m, n_data=n_data, save=True)
    loss = jax.block_until_ready(loss)

    # --------------------- pure-JAX reference ---------------------
    HI = jax.lax.Precision.HIGHEST

    def ref_normalize(x):
        return x / jnp.sqrt(jnp.sum(x * x, axis=1, keepdims=True))

    def ref_contrast_loss(x, n_data):
        b, k1p, _ = x.shape
        m = k1p - 1
        pn = 1.0 / n_data
        p_pos = x[:, 0]
        d1 = p_pos / (p_pos + m * pn + EPS)
        p_neg = x[:, 1:]
        d0 = (m * pn) / (p_neg + m * pn + EPS)
        return -(jnp.sum(jnp.log(d1)) + jnp.sum(jnp.log(d0))) / b

    rv1 = ref_normalize(jnp.dot(f_s, params["w_s"], precision=HI) + params["b_s"])
    rv2 = ref_normalize(jnp.dot(f_t, params["w_t"], precision=HI) + params["b_t"])
    ridx = jnp.concatenate([y[:, None], contrast_idx], axis=1)
    rw1 = params["memory_v1"][ridx.reshape(-1)].reshape(bsz, nce_k + 1, feat_dim)
    rw2 = params["memory_v2"][ridx.reshape(-1)].reshape(bsz, nce_k + 1, feat_dim)
    rout_v2 = jnp.exp(jnp.einsum("bkd,bd->bk", rw1, rv2, precision=HI)[..., None] / nce_t)
    rout_v1 = jnp.exp(jnp.einsum("bkd,bd->bk", rw2, rv1, precision=HI)[..., None] / nce_t)
    ref_loss = ref_contrast_loss(rout_v1, n_data) + ref_contrast_loss(rout_v2, n_data)
    ref_mem1 = params["memory_v1"].at[y].set(
        ref_normalize(params["memory_v1"][y] * nce_m + rv1 * (1 - nce_m)))
    ref_mem2 = params["memory_v2"].at[y].set(
        ref_normalize(params["memory_v2"][y] * nce_m + rv2 * (1 - nce_m)))

    assert jnp.allclose(loss, ref_loss, rtol=1e-2, atol=1e-2), (loss, ref_loss)
    assert jnp.allclose(mem1, ref_mem1, rtol=5e-3, atol=5e-3)
    assert jnp.allclose(mem2, ref_mem2, rtol=5e-3, atol=5e-3)

    print("KERNEL_OK")
</pallas_src>

<mosaic_0001>
module attributes {stable_mosaic.version = 11 : i64} {
  func.func @_embed_kernel(%arg0: i32, %arg1: i32, %arg2: memref<8x256xf32, #tpu.memory_space<vmem>>, %arg3: memref<256x128xf32, #tpu.memory_space<vmem>>, %arg4: memref<1x128xf32, #tpu.memory_space<vmem>>, %arg5: memref<8x128xf32, #tpu.memory_space<vmem>>, %arg6: memref<8x128xf32, #tpu.memory_space<vmem>>) attributes {dimension_semantics = [#tpu.dimension_semantics<parallel>, #tpu.dimension_semantics<arbitrary>], iteration_bounds = array<i64: 1, 1>, scalar_prefetch = 0 : i64, scratch_operands = 1 : i64, tpu.core_type = #tpu.core_type<tc>, window_params = [{transform_indices = @transform_0, window_bounds = array<i64: 8, 256>}, {transform_indices = @transform_1, window_bounds = array<i64: 256, 128>}, {pipeline_mode = #tpu.pipeline_mode<synchronous>, transform_indices = @transform_2, window_bounds = array<i64: 1, 128>}, {transform_indices = @transform_3, window_bounds = array<i64: 8, 128>}]} {
    %c0_i32 = arith.constant 0 : i32
    %0 = arith.cmpi eq, %arg1, %c0_i32 : i32
    %1 = arith.extui %0 : i1 to i32
    %c0_i32_0 = arith.constant 0 : i32
    %2 = arith.cmpi ne, %1, %c0_i32_0 : i32
    scf.if %2 {
      %cst_10 = arith.constant 0.000000e+00 : f32
      %12 = vector.broadcast %cst_10 : f32 to vector<8x128xf32>
      %c0_11 = arith.constant 0 : index
      %c0_12 = arith.constant 0 : index
      %13 = vector.load %arg6[%c0_11, %c0_12] : memref<8x128xf32, #tpu.memory_space<vmem>>, vector<8x128xf32>
      tpu.vector_store %arg6[%c0_11, %c0_12], %12 {strides = array<i32>} : memref<8x128xf32, #tpu.memory_space<vmem>>, vector<8x128xf32>,
    } else {
    }
    %c0 = arith.constant 0 : index
    %c0_1 = arith.constant 0 : index
    %3 = vector.load %arg6[%c0, %c0_1] : memref<8x128xf32, #tpu.memory_space<vmem>>, vector<8x128xf32>
    %c0_2 = arith.constant 0 : index
    %c0_3 = arith.constant 0 : index
    %4 = vector.load %arg2[%c0_2, %c0_3] : memref<8x256xf32, #tpu.memory_space<vmem>>, vector<8x256xf32>
    %c0_4 = arith.constant 0 : index
    %c0_5 = arith.constant 0 : index
    %5 = vector.load %arg3[%c0_4, %c0_5] : memref<256x128xf32, #tpu.memory_space<vmem>>, vector<256x128xf32>
    %cst = arith.constant dense<0.000000e+00> : vector<8x128xf32>
    %6 = tpu.matmul %4, %5, %cst {dimension_numbers = #tpu.dot_dimension_numbers<[1], [0], [0], [1], [0, 0, 1, 1], [], []>} : vector<8x256xf32>, vector<256x128xf32>, vector<8x128xf32> -> vector<8x128xf32>
    %7 = arith.addf %3, %6 : vector<8x128xf32>
    %c0_6 = arith.constant 0 : index
    %c0_7 = arith.constant 0 : index
    %8 = vector.load %arg6[%c0_6, %c0_7] : memref<8x128xf32, #tpu.memory_space<vmem>>, vector<8x128xf32>
    tpu.vector_store %arg6[%c0_6, %c0_7], %7 {strides = array<i32>} : memref<8x128xf32, #tpu.memory_space<vmem>>, vector<8x128xf32>,
    %c0_i32_8 = arith.constant 0 : i32
    %9 = arith.cmpi eq, %arg1, %c0_i32_8 : i32
    %10 = arith.extui %9 : i1 to i32
    %c0_i32_9 = arith.constant 0 : i32
    %11 = arith.cmpi ne, %10, %c0_i32_9 : i32
    scf.if %11 {
      %c0_10 = arith.constant 0 : index
      %c0_11 = arith.constant 0 : index
      %12 = vector.load %arg6[%c0_10, %c0_11] : memref<8x128xf32, #tpu.memory_space<vmem>>, vector<8x128xf32>
      %c0_12 = arith.constant 0 : index
      %c0_13 = arith.constant 0 : index
      %13 = vector.load %arg4[%c0_12, %c0_13] : memref<1x128xf32, #tpu.memory_space<vmem>>, vector<1x128xf32>
      %14 = vector.broadcast %13 : vector<1x128xf32> to vector<8x128xf32>
      %15 = arith.addf %12, %14 : vector<8x128xf32>
      %16 = arith.mulf %15, %15 : vector<8x128xf32>
      %cst_14 = arith.constant dense<0.000000e+00> : vector<8xf32>
      %17 = vector.multi_reduction <add>, %16, %cst_14 [1] : vector<8x128xf32> to vector<8xf32>
      %18 = vector.shape_cast %17 : vector<8xf32> to vector<8x1xf32>
      %19 = math.rsqrt %18 : vector<8x1xf32>
      %20 = vector.broadcast %19 : vector<8x1xf32> to vector<8x128xf32>
      %21 = arith.mulf %15, %20 : vector<8x128xf32>
      %c0_15 = arith.constant 0 : index
      %c0_16 = arith.constant 0 : index
      %22 = vector.load %arg5[%c0_15, %c0_16] : memref<8x128xf32, #tpu.memory_space<vmem>>, vector<8x128xf32>
      tpu.vector_store %arg5[%c0_15, %c0_16], %21 {strides = array<i32>} : memref<8x128xf32, #tpu.memory_space<vmem>>, vector<8x128xf32>,
    } else {
    }
    return
  }
  func.func @transform_0(%arg0: i32, %arg1: i32) -> (i32, i32) {
    %c0_i32 = arith.constant 0 : i32
    return %arg0, %arg1 : i32, i32
  }
  func.func @transform_1(%arg0: i32, %arg1: i32) -> (i32, i32) {
    %c0_i32 = arith.constant 0 : i32
    %c0_i32_0 = arith.constant 0 : i32
    return %arg1, %c0_i32 : i32, i32
  }
  func.func @transform_2(%arg0: i32, %arg1: i32) -> (i32, i32) {
    %c0_i32 = arith.constant 0 : i32
    %c0_i32_0 = arith.constant 0 : i32
    %c0_i32_1 = arith.constant 0 : i32
    return %c0_i32, %c0_i32_0 : i32, i32
  }
  func.func @transform_3(%arg0: i32, %arg1: i32) -> (i32, i32) {
    %c0_i32 = arith.constant 0 : i32
    %c0_i32_0 = arith.constant 0 : i32
    return %arg0, %c0_i32 : i32, i32
  }
}

</mosaic_0001>

<bundles_post_ra>
// kernel: tpu_custom_call.1
= control target key start
LH: loop header
LB: loop body
LE: loop exit
PB: predicated region body
PF: predicated region fallthrough
CT: control target
= control target key end

     0   :  { %8 = vsyncpa [#allocation4], 0  ;;  %s292_s0 = inlined_call_operand.hbm [shape: f32[8,256], index: 0, kind: input, shape index: {}]   ;;  %s293_s1 = inlined_call_operand.hbm [shape: f32[256,128], index: 1, kind: input, shape index: {}]   ;;  %s294_s2 = inlined_call_operand.vmem [shape: f32[1,128], index: 2, kind: input, shape index: {}]   ;;  %s295_s3 = inlined_call_operand.hbm [shape: f32[8,128], index: 3, kind: output, shape index: {}]  }
   0x1   :  { %9 = vsyncpa [#allocation7], 0 }
   0x2   :  { %10 = vsyncpa [#allocation5], 0  ;;  %s16_s14 = sshll.u32 %s292_s0, 4  ;;  %s255_s15 = smov [#allocation3]   ;;  %s17_s14 = int_to_ptr.hbm [resolvable:$true] %s16_s14 }
   0x3   :  { %s18_s16 = sshll.u32 %s255_s15, 4  ;;  %s26_s19 = sshll.u32 %s293_s1, 4  ;;  %s19_s16 = int_to_ptr.vmem [resolvable:$true] %s18_s16  ;;  %s27_s19 = int_to_ptr.hbm [resolvable:$true] %s26_s19 }
   0x4   :  { %21 = dma.hbm_to_vmem [thread:$0]  %s17_s14, 256, %s19_s16, [#allocation4]  }
   0x5   :  { %s256_s20 = smov [#allocation6]   ;;  %s257_s22 = smov 128  }
   0x6   :  { %s28_s21 = sshll.u32 %s256_s20, 4  ;;  %s258_s23 = smov 8   ;;  %s29_s21 = int_to_ptr.vmem [resolvable:$true] %s28_s21 }
   0x7   :  { %34 = dma.hbm_to_vmem [thread:$0]  %s27_s19, 4096, %s29_s21, [#allocation7], %s257_s22, %s257_s22, %s258_s23  }
   0x8   :  { %249 = dma.done.wait [#allocation4], 256  }
   0x9   :  { %250 = vsyncadd [#allocation4], 4294967040 }
   0xa   :  { %251 = dma.done.wait [#allocation7], 4096  }
   0xb   :  { %252 = vsyncadd [#allocation7], 4294963200  ;;  %v68_v0 = vld [vmem:[#allocation6 + $0x78] sm:$0xff]  ;;  %v67_v2 = vld [vmem:[#allocation6 + $0x70] sm:$0xff]  ;;  %s259_s24 = smov [#allocation8]   ;;  %s158_s27 = sshll.u32 %s295_s3, 4  ;;  %s159_s27 = int_to_ptr.hbm [resolvable:$true] %s158_s27 }
   0xc   :  { %v84_v1 = vld [vmem:[#allocation6 + $0xf8] sm:$0xff]  ;;  %85 = vmatpush.msra.mxu0 %v68_v0  ;;  %v83_v3 = vld [vmem:[#allocation6 + $0xf0] sm:$0xff]  ;;  %v66_v4 = vld [vmem:[#allocation6 + $0x68] sm:$0xff]  ;;  %s156_s25 = sshll.u32 %s259_s24, 4  ;;  %s157_s25 = int_to_ptr.vmem [resolvable:$true] %s156_s25 }
   0xd   :  { %105 = vmatpush.msra.mxu1 %v84_v1  ;;  %v82_v5 = vld [vmem:[#allocation6 + $0xe8] sm:$0xff]  ;;  %v65_v6 = vld [vmem:[#allocation6 + $0x60] sm:$0xff]  ;;  %v64_v8 = vld [vmem:[#allocation6 + $0x58] sm:$0xff] }
   0xe   :  { %86 = vmatpush.msra.mxu0 %v67_v2  ;;  %v81_v7 = vld [vmem:[#allocation6 + $0xe0] sm:$0xff]  ;;  %v80_v9 = vld [vmem:[#allocation6 + $0xd8] sm:$0xff]  ;;  %v63_v10 = vld [vmem:[#allocation6 + $0x50] sm:$0xff] }
   0xf   :  { %106 = vmatpush.msra.mxu1 %v83_v3  ;;  %v79_v11 = vld [vmem:[#allocation6 + $0xd0] sm:$0xff]  ;;  %v62_v12 = vld [vmem:[#allocation6 + $0x48] sm:$0xff]  ;;  %v61_v14 = vld [vmem:[#allocation6 + $0x40] sm:$0xff] }
  0x10   :  { %87 = vmatpush.msra.mxu0 %v66_v4  ;;  %v78_v13 = vld [vmem:[#allocation6 + $0xc8] sm:$0xff]  ;;  %v77_v15 = vld [vmem:[#allocation6 + $0xc0] sm:$0xff]  ;;  %v60_v16 = vld [vmem:[#allocation6 + $0x38] sm:$0xff] }
  0x11   :  { %107 = vmatpush.msra.mxu1 %v82_v5  ;;  %v76_v17 = vld [vmem:[#allocation6 + $0xb8] sm:$0xff]  ;;  %v59_v18 = vld [vmem:[#allocation6 + $0x30] sm:$0xff]  ;;  %v58_v20 = vld [vmem:[#allocation6 + $0x28] sm:$0xff] }
  0x12   :  { %88 = vmatpush.msra.mxu0 %v65_v6  ;;  %v75_v19 = vld [vmem:[#allocation6 + $0xb0] sm:$0xff]  ;;  %v74_v21 = vld [vmem:[#allocation6 + $0xa8] sm:$0xff]  ;;  %v57_v22 = vld [vmem:[#allocation6 + $0x20] sm:$0xff] }
  0x13   :  { %108 = vmatpush.msra.mxu1 %v81_v7  ;;  %v73_v23 = vld [vmem:[#allocation6 + $0xa0] sm:$0xff]  ;;  %v56_v24 = vld [vmem:[#allocation6 + $0x18] sm:$0xff]  ;;  %v55_v26 = vld [vmem:[#allocation6 + $0x10] sm:$0xff] }
  0x14   :  { %89 = vmatpush.msra.mxu0 %v64_v8  ;;  %v72_v25 = vld [vmem:[#allocation6 + $0x98] sm:$0xff]  ;;  %v71_v27 = vld [vmem:[#allocation6 + $0x90] sm:$0xff]  ;;  %v54_v28 = vld [vmem:[#allocation6 + $0x8] sm:$0xff] }
  0x15   :  { %109 = vmatpush.msra.mxu1 %v80_v9  ;;  %v70_v29 = vld [vmem:[#allocation6 + $0x88] sm:$0xff]  ;;  %v53_v30 = vld [vmem:[#allocation6] sm:$0xff]  ;;  %v51_v32 = vld [vmem:[#allocation3] sm:$0xff] }
  0x16   :  { %90 = vmatpush.msra.mxu0 %v63_v10  ;;  %v69_v31 = vld [vmem:[#allocation6 + $0x80] sm:$0xff]  ;;  %v52_v33 = vld [vmem:[#allocation3 + $0x8] sm:$0xff]  ;;  %v174_v34 = vld [vmem:[%s294_s2] ss:$0 sm:$0xff] }
  0x17   :  { %110 = vmatpush.msra.mxu1 %v79_v11 }
  0x18   :  { %91 = vmatpush.msra.mxu0 %v62_v12 }
  0x19   :  { %111 = vmatpush.msra.mxu1 %v78_v13 }
  0x1a   :  { %92 = vmatpush.msra.mxu0 %v61_v14 }
  0x1b   :  { %112 = vmatpush.msra.mxu1 %v77_v15 }
  0x1c   :  { %93 = vmatpush.msra.mxu0 %v60_v16 }
  0x1d   :  { %113 = vmatpush.msra.mxu1 %v76_v17 }
  0x1e   :  { %94 = vmatpush.msra.mxu0 %v59_v18 }
  0x1f   :  { %114 = vmatpush.msra.mxu1 %v75_v19 }
  0x20   :  { %95 = vmatpush.msra.mxu0 %v58_v20 }
  0x21   :  { %115 = vmatpush.msra.mxu1 %v74_v21 }
  0x22   :  { %96 = vmatpush.msra.mxu0 %v57_v22 }
  0x23   :  { %116 = vmatpush.msra.mxu1 %v73_v23 }
  0x24   :  { %97 = vmatpush.msra.mxu0 %v56_v24 }
  0x25   :  { %117 = vmatpush.msra.mxu1 %v72_v25 }
  0x26   :  { %98 = vmatpush.msra.mxu0 %v55_v26 }
  0x27   :  { %118 = vmatpush.msra.mxu1 %v71_v27 }
  0x28   :  { %99 = vmatpush.msra.mxu0 %v54_v28 }
  0x29   :  { %119 = vmatpush.msra.mxu1 %v70_v29 }
  0x2a   :  { %100 = vmatpush.msra.mxu0 %v53_v30 }
  0x2b   :  { %120 = vmatpush.msra.mxu1 %v69_v31  ;;  %101 = vmatmul.f32.vlgmr.msra.gmra.mxu0 %v51_v32 }
  0x2c   :  { %121 = vmatmul.f32.vlgmr.msra.gmra.mxu1 %v52_v33 }
  0xa8   :  { %v102_v35 = vpop.f32.mrf.mxu0 }
  0xa9   :  { %v122_v36 = vpop.f32.mrf.mxu1 }
  0xaa   :  { %v123_v37 = vadd.f32 %v122_v36, %v102_v35 }
  0xac   :  { %v135_v38 = vadd.f32 %v174_v34, %v123_v37 }
  0xae   :  { %v136_v39 = vmul.f32 %v135_v38, %v135_v38 }
  0xb0   :  { %137 = vadd.xlane.f32.xlu0 %v136_v39 }
 0x123   :  { %v138_v40 = vpop.xlane.xlu0 %137 }
 0x124   :  { %175 = vrsqrt.f32 %v138_v40  ;;  %vm145_vm1 = vweird.f32 %v138_v40 }
 0x12a   :  { %v176_v41 = vpop.eup %175 }
 0x12b   :  { %v140_v42 = vmul.f32 %v176_v41, %v138_v40  ;;  %vm146_vm0 = vweird.f32 %v176_v41 }
 0x12c   :  { %vm147_vm2 = vmor %vm145_vm1, %vm146_vm0 }
 0x12d   :  { %v141_v43 = vmul.f32 %v176_v41, %v140_v42 }
 0x12f   :  { %v142_v44 = vmul.f32 0.5, %v141_v43 }
 0x131   :  { %v143_v45 = vsub.f32 1.5, %v142_v44 }
 0x133   :  { %v144_v46 = vmul.f32 %v176_v41, %v143_v45 }
 0x135   :  { %v148_v47 = vsel %vm147_vm2, %v176_v41, %v144_v46 }
 0x136   :  { %v149_v48 = vmul.f32 %v148_v47, %v135_v38 }
 0x138   :  { %150 = vst [vmem:[#allocation8] sm:$0xff] %v149_v48 }
 0x139   :  { %161 = dma.vmem_to_hbm [thread:$0]  %s157_s25, 128, %s159_s27, [#allocation5]  }
 0x13a   :  { %253 = dma.done.wait [#allocation5], 128  }
 0x13b   :  { %254 = vsyncadd [#allocation5], 4294967168 }
 0x13c   :  { %166 = vsyncpa [#allocation4], 1 }
 0x13d   :  { %167 = vsyncpa [#allocation7], 1 }
 0x13e   :  { %168 = vsyncpa [#allocation5], 1 }

</bundles_post_ra>
